<compile_context>
chip_gen: v6e
topology: v6e:2x2x1
jax: 0.10.0
libtpu: 0.0.40
codegen_flags: <defaults>
</compile_context>

<pallas_src>
import functools

import numpy as np
import jax
import jax.numpy as jnp
from jax import lax
from jax.experimental import pallas as pl
from jax.experimental.pallas import tpu as pltpu

EPS = 1e-5


# ------------------------------- Pallas kernel ------------------------------


def _resblock_kernel(x_ref, wb1_ref, wb2_ref, wb3_ref, sh_ref, o_ref,
                     y1p_ref, y2p_ref, *, h):
    """Fused conv1+BN+ReLU -> conv2+BN+ReLU -> conv3+BN -> +residual -> ReLU.

    x_ref   : VMEM (h+2, w*cin)      row-padded input, channels fused into lanes
    wb*_ref : VMEM (3, K, w*cout)    banded weight matrices (one per vertical tap)
    sh_ref  : VMEM (3, 1, w*cout)    BN shifts, already tiled across lanes
    o_ref   : VMEM (h, w*cout)       output block (lane-dense)
    y1p/y2p : VMEM (h+2, w*cout)     row-padded intermediates (scratch)
    """
    lanes = y1p_ref.shape[1]
    zrow = jnp.zeros((1, lanes), jnp.float32)
    # Only the padding rows need zeroing; interior rows are rewritten below.
    # Done every grid step so it is safe under per-core grid splitting.
    y1p_ref[pl.ds(0, 1), :] = zrow
    y1p_ref[pl.ds(h + 1, 1), :] = zrow
    y2p_ref[pl.ds(0, 1), :] = zrow
    y2p_ref[pl.ds(h + 1, 1), :] = zrow

    def conv(src_ref, wb_ref, shift, act):
        # 3x3 'same' conv as 3 MXU matmuls: one per vertical tap kh.  The
        # banded matrix handles the horizontal taps + width zero padding.
        acc = jnp.zeros((h, wb_ref.shape[2]), jnp.float32)
        for kh in range(3):                       # fully unrolled
            acc = acc + jnp.dot(src_ref[pl.ds(kh, h), :], wb_ref[kh],
                                preferred_element_type=jnp.float32)
        acc = acc + shift                          # BN shift (per-lane bias)
        return jnp.maximum(acc, 0.0) if act else acc

    # conv1 + BN + ReLU   (in_ch  -> out_ch)
    y1 = conv(x_ref, wb1_ref, sh_ref[0], True)
    y1p_ref[pl.ds(1, h), :] = y1
    # conv2 + BN + ReLU   (out_ch -> out_ch)
    y2 = conv(y1p_ref, wb2_ref, sh_ref[1], True)
    y2p_ref[pl.ds(1, h), :] = y2
    # conv3 + BN, then residual add and final ReLU
    y3 = conv(y2p_ref, wb3_ref, sh_ref[2], False)
    o_ref[...] = jnp.maximum(y1 + y3, 0.0).astype(o_ref.dtype)


# ------------------------------ wrapper / glue -------------------------------


def _banded(wk, width):
    """(Cout, Cin, 3, 3) scale-folded OIHW kernel -> (3, width*Cin, width*Cout).

    For each vertical tap kh, builds a block-tridiagonal matrix B with
    B[w_in*Cin + i, w_out*Cout + o] = wk[o, i, kh, w_in - w_out + 1]
    (zero outside the band), so `row_slab @ B` performs the horizontal taps of
    a 'same'-padded 3x3 conv in one matmul.
    """
    cout, cin = wk.shape[0], wk.shape[1]
    mats = []
    for kh in range(3):
        m = jnp.zeros((width, width, cin, cout), jnp.float32)  # (w_in, w_out, ci, co)
        for kw in range(3):
            w_in = np.arange(width)
            w_out = w_in + 1 - kw
            sel = (w_out >= 0) & (w_out < width)
            m = m.at[w_in[sel], w_out[sel]].set(wk[:, :, kh, kw].T)
        mats.append(m.transpose(0, 2, 1, 3).reshape(width * cin, width * cout))
    return jnp.stack(mats)


def resblock_forward(x_nchw, params):
    """ResBlock forward. Input/output NCHW; stride=1, 'same' 3x3 convs."""
    n, cin, h, w = x_nchw.shape
    cout = params["w1"].shape[0]

    # Host-side glue: fold BN scale into the conv weights, build the banded
    # matmul weights, tile the BN shifts across lanes, and re-layout the input.
    w1 = params["w1"] * params["s1"][:, None, None, None]
    w2 = params["w2"] * params["s2"][:, None, None, None]
    w3 = params["w3"] * params["s3"][:, None, None, None]
    wb1 = _banded(w1, w)                                   # (3, w*cin,  w*cout)
    wb2 = _banded(w2, w)                                   # (3, w*cout, w*cout)
    wb3 = _banded(w3, w)
    sh = jnp.stack([jnp.tile(params["b1"], w),
                    jnp.tile(params["b2"], w),
                    jnp.tile(params["b3"], w)]).astype(jnp.float32)[:, None, :]

    # NCHW -> (N, H+2, W*Cin): channel innermost within each pixel's lane
    # group, zero rows top/bottom for the vertical 'same' padding.
    x_l = jnp.transpose(x_nchw, (0, 2, 3, 1)).reshape(n, h, w * cin)
    x_l = jnp.pad(x_l, ((0, 0), (1, 1), (0, 0)))

    kernel = functools.partial(_resblock_kernel, h=h)
    out_flat = pl.pallas_call(
        kernel,
        out_shape=jax.ShapeDtypeStruct((n, h, w * cout), x_nchw.dtype),
        grid_spec=pltpu.PrefetchScalarGridSpec(
            num_scalar_prefetch=0,
            grid=(n,),                                     # one batch elem / step
            in_specs=[
                pl.BlockSpec((None, h + 2, w * cin), lambda i: (i, 0, 0)),
                pl.BlockSpec((3, w * cin, w * cout), lambda i: (0, 0, 0)),
                pl.BlockSpec((3, w * cout, w * cout), lambda i: (0, 0, 0)),
                pl.BlockSpec((3, w * cout, w * cout), lambda i: (0, 0, 0)),
                pl.BlockSpec((3, 1, w * cout), lambda i: (0, 0, 0)),
            ],
            out_specs=pl.BlockSpec((None, h, w * cout), lambda i: (i, 0, 0)),
            scratch_shapes=[pltpu.VMEM((h + 2, w * cout), jnp.float32),
                            pltpu.VMEM((h + 2, w * cout), jnp.float32)]),
        compiler_params=pltpu.CompilerParams(
            dimension_semantics=("parallel",)),            # batch axis is independent
    )(x_l, wb1, wb2, wb3, sh)

    # (N, H, W*Cout) -> NCHW
    return jnp.transpose(out_flat.reshape(n, h, w, cout), (0, 3, 1, 2))


# ---------------------------- params & reference -----------------------------


def init_params(key, in_ch, out_ch):
    ks = jax.random.split(key, 15)

    def bn_fold(kg, kb, km, kv, c):
        gamma = 1.0 + 0.1 * jax.random.normal(kg, (c,), jnp.float32)
        beta = 0.1 * jax.random.normal(kb, (c,), jnp.float32)
        mean = 0.1 * jax.random.normal(km, (c,), jnp.float32)
        var = jax.nn.softplus(jax.random.normal(kv, (c,), jnp.float32)) + 0.5
        scale = gamma / jnp.sqrt(var + EPS)
        shift = beta - mean * scale
        return scale, shift

    def conv_w(k, ci, co):
        return jax.random.normal(k, (co, ci, 3, 3), jnp.float32) / jnp.sqrt(9.0 * ci)

    w1 = conv_w(ks[0], in_ch, out_ch)
    s1, b1 = bn_fold(ks[1], ks[2], ks[3], ks[4], out_ch)
    w2 = conv_w(ks[5], out_ch, out_ch)
    s2, b2 = bn_fold(ks[6], ks[7], ks[8], ks[9], out_ch)
    w3 = conv_w(ks[10], out_ch, out_ch)
    s3, b3 = bn_fold(ks[11], ks[12], ks[13], ks[14], out_ch)
    return dict(w1=w1, s1=s1, b1=b1, w2=w2, s2=s2, b2=b2, w3=w3, s3=s3, b3=b3)


def ref_forward(x, p):
    """Pure-JAX reference (NCHW) for correctness checking."""
    def conv_bn(z, wgt, scale, shift, act):
        y = lax.conv_general_dilated(
            z, wgt, window_strides=(1, 1), padding=[(1, 1), (1, 1)],
            dimension_numbers=("NCHW", "OIHW", "NCHW"),
            precision=lax.Precision.HIGHEST)
        y = y * scale[None, :, None, None] + shift[None, :, None, None]
        return jnp.maximum(y, 0.0) if act else y

    y1 = conv_bn(x, p["w1"], p["s1"], p["b1"], True)
    y2 = conv_bn(y1, p["w2"], p["s2"], p["b2"], True)
    y3 = conv_bn(y2, p["w3"], p["s3"], p["b3"], False)
    return jnp.maximum(y1 + y3, 0.0)


if __name__ == "__main__":
    key = jax.random.PRNGKey(0)
    kx, kp = jax.random.split(key)

    N, IN_CH, OUT_CH, H, W = 2, 4, 8, 16, 16          # NCHW input
    x = jax.random.normal(kx, (N, IN_CH, H, W), jnp.float32)
    params = init_params(kp, IN_CH, OUT_CH)

    out = jax.jit(resblock_forward)(x, params)
    out = jax.block_until_ready(out)
    assert out.shape == (N, OUT_CH, H, W)

    ref = ref_forward(x, params)
    max_err = float(jnp.max(jnp.abs(out - ref)))
    # MXU f32 matmuls may use multi-pass accumulation; leave a small numeric
    # margin (structural/indexing bugs would show up as O(0.1..1) errors).
    assert max_err < 2e-3, f"mismatch vs reference: {max_err}"

    print("KERNEL_OK")
</pallas_src>

<mosaic_0001>
module attributes {stable_mosaic.version = 11 : i64} {
  func.func @_resblock_kernel(%arg0: i32, %arg1: memref<1x18x64xf32, #tpu.memory_space<vmem>>, %arg2: memref<3x64x128xf32, #tpu.memory_space<vmem>>, %arg3: memref<3x128x128xf32, #tpu.memory_space<vmem>>, %arg4: memref<3x128x128xf32, #tpu.memory_space<vmem>>, %arg5: memref<3x1x128xf32, #tpu.memory_space<vmem>>, %arg6: memref<1x16x128xf32, #tpu.memory_space<vmem>>, %arg7: memref<18x128xf32, #tpu.memory_space<vmem>>, %arg8: memref<18x128xf32, #tpu.memory_space<vmem>>) attributes {dimension_semantics = [#tpu.dimension_semantics<parallel>], iteration_bounds = array<i64: 2>, scalar_prefetch = 0 : i64, scratch_operands = 2 : i64, tpu.core_type = #tpu.core_type<tc>, window_params = [{transform_indices = @transform_0, window_bounds = array<i64: 1, 18, 64>}, {pipeline_mode = #tpu.pipeline_mode<synchronous>, transform_indices = @transform_1, window_bounds = array<i64: 3, 64, 128>}, {pipeline_mode = #tpu.pipeline_mode<synchronous>, transform_indices = @transform_2, window_bounds = array<i64: 3, 128, 128>}, {pipeline_mode = #tpu.pipeline_mode<synchronous>, transform_indices = @transform_3, window_bounds = array<i64: 3, 128, 128>}, {pipeline_mode = #tpu.pipeline_mode<synchronous>, transform_indices = @transform_4, window_bounds = array<i64: 3, 1, 128>}, {transform_indices = @transform_5, window_bounds = array<i64: 1, 16, 128>}]} {
    %cst = arith.constant 0.000000e+00 : f32
    %0 = vector.broadcast %cst : f32 to vector<1x128xf32>
    %c0 = arith.constant 0 : index
    %c0_0 = arith.constant 0 : index
    %1 = vector.load %arg7[%c0, %c0_0] : memref<18x128xf32, #tpu.memory_space<vmem>>, vector<1x128xf32>
    tpu.vector_store %arg7[%c0, %c0_0], %0 {strides = array<i32>} : memref<18x128xf32, #tpu.memory_space<vmem>>, vector<1x128xf32>,
    %c17 = arith.constant 17 : index
    %c0_1 = arith.constant 0 : index
    %2 = vector.load %arg7[%c17, %c0_1] : memref<18x128xf32, #tpu.memory_space<vmem>>, vector<1x128xf32>
    tpu.vector_store %arg7[%c17, %c0_1], %0 {strides = array<i32>} : memref<18x128xf32, #tpu.memory_space<vmem>>, vector<1x128xf32>,
    %c0_2 = arith.constant 0 : index
    %c0_3 = arith.constant 0 : index
    %3 = vector.load %arg8[%c0_2, %c0_3] : memref<18x128xf32, #tpu.memory_space<vmem>>, vector<1x128xf32>
    tpu.vector_store %arg8[%c0_2, %c0_3], %0 {strides = array<i32>} : memref<18x128xf32, #tpu.memory_space<vmem>>, vector<1x128xf32>,
    %c17_4 = arith.constant 17 : index
    %c0_5 = arith.constant 0 : index
    %4 = vector.load %arg8[%c17_4, %c0_5] : memref<18x128xf32, #tpu.memory_space<vmem>>, vector<1x128xf32>
    tpu.vector_store %arg8[%c17_4, %c0_5], %0 {strides = array<i32>} : memref<18x128xf32, #tpu.memory_space<vmem>>, vector<1x128xf32>,
    %c0_6 = arith.constant 0 : index
    %c0_7 = arith.constant 0 : index
    %c0_8 = arith.constant 0 : index
    %5 = vector.load %arg5[%c0_6, %c0_7, %c0_8] : memref<3x1x128xf32, #tpu.memory_space<vmem>>, vector<1x1x128xf32>
    %6 = vector.shape_cast %5 : vector<1x1x128xf32> to vector<1x128xf32>
    %cst_9 = arith.constant 0.000000e+00 : f32
    %7 = vector.broadcast %cst_9 : f32 to vector<16x128xf32>
    %c0_10 = arith.constant 0 : index
    %c0_11 = arith.constant 0 : index
    %c0_12 = arith.constant 0 : index
    %8 = vector.load %arg1[%c0_10, %c0_11, %c0_12] : memref<1x18x64xf32, #tpu.memory_space<vmem>>, vector<1x16x64xf32>
    %9 = vector.shape_cast %8 : vector<1x16x64xf32> to vector<16x64xf32>
    %c0_13 = arith.constant 0 : index
    %c0_14 = arith.constant 0 : index
    %c0_15 = arith.constant 0 : index
    %10 = vector.load %arg2[%c0_13, %c0_14, %c0_15] : memref<3x64x128xf32, #tpu.memory_space<vmem>>, vector<1x64x128xf32>
    %11 = vector.shape_cast %10 : vector<1x64x128xf32> to vector<64x128xf32>
    %cst_16 = arith.constant dense<0.000000e+00> : vector<16x128xf32>
    %12 = tpu.matmul %9, %11, %cst_16 {dimension_numbers = #tpu.dot_dimension_numbers<[1], [0], [0], [1], [0, 0, 1, 1], [], []>} : vector<16x64xf32>, vector<64x128xf32>, vector<16x128xf32> -> vector<16x128xf32>
    %13 = arith.addf %7, %12 : vector<16x128xf32>
    %c0_17 = arith.constant 0 : index
    %c1 = arith.constant 1 : index
    %c0_18 = arith.constant 0 : index
    %14 = vector.load %arg1[%c0_17, %c1, %c0_18] : memref<1x18x64xf32, #tpu.memory_space<vmem>>, vector<1x16x64xf32>
    %15 = vector.shape_cast %14 : vector<1x16x64xf32> to vector<16x64xf32>
    %c1_19 = arith.constant 1 : index
    %c0_20 = arith.constant 0 : index
    %c0_21 = arith.constant 0 : index
    %16 = vector.load %arg2[%c1_19, %c0_20, %c0_21] : memref<3x64x128xf32, #tpu.memory_space<vmem>>, vector<1x64x128xf32>
    %17 = vector.shape_cast %16 : vector<1x64x128xf32> to vector<64x128xf32>
    %cst_22 = arith.constant dense<0.000000e+00> : vector<16x128xf32>
    %18 = tpu.matmul %15, %17, %cst_22 {dimension_numbers = #tpu.dot_dimension_numbers<[1], [0], [0], [1], [0, 0, 1, 1], [], []>} : vector<16x64xf32>, vector<64x128xf32>, vector<16x128xf32> -> vector<16x128xf32>
    %19 = arith.addf %13, %18 : vector<16x128xf32>
    %c0_23 = arith.constant 0 : index
    %c2 = arith.constant 2 : index
    %c0_24 = arith.constant 0 : index
    %20 = vector.load %arg1[%c0_23, %c2, %c0_24] : memref<1x18x64xf32, #tpu.memory_space<vmem>>, vector<1x16x64xf32>
    %21 = vector.shape_cast %20 : vector<1x16x64xf32> to vector<16x64xf32>
    %c2_25 = arith.constant 2 : index
    %c0_26 = arith.constant 0 : index
    %c0_27 = arith.constant 0 : index
    %22 = vector.load %arg2[%c2_25, %c0_26, %c0_27] : memref<3x64x128xf32, #tpu.memory_space<vmem>>, vector<1x64x128xf32>
    %23 = vector.shape_cast %22 : vector<1x64x128xf32> to vector<64x128xf32>
    %cst_28 = arith.constant dense<0.000000e+00> : vector<16x128xf32>
    %24 = tpu.matmul %21, %23, %cst_28 {dimension_numbers = #tpu.dot_dimension_numbers<[1], [0], [0], [1], [0, 0, 1, 1], [], []>} : vector<16x64xf32>, vector<64x128xf32>, vector<16x128xf32> -> vector<16x128xf32>
    %25 = arith.addf %19, %24 : vector<16x128xf32>
    %26 = vector.broadcast %6 : vector<1x128xf32> to vector<16x128xf32>
    %27 = arith.addf %25, %26 : vector<16x128xf32>
    %cst_29 = arith.constant 0.000000e+00 : f32
    %28 = vector.broadcast %cst_29 : f32 to vector<16x128xf32>
    %29 = arith.maximumf %27, %28 : vector<16x128xf32>
    %c1_30 = arith.constant 1 : index
    %c0_31 = arith.constant 0 : index
    %30 = vector.load %arg7[%c1_30, %c0_31] : memref<18x128xf32, #tpu.memory_space<vmem>>, vector<16x128xf32>
    tpu.vector_store %arg7[%c1_30, %c0_31], %29 {strides = array<i32>} : memref<18x128xf32, #tpu.memory_space<vmem>>, vector<16x128xf32>,
    %c1_32 = arith.constant 1 : index
    %c0_33 = arith.constant 0 : index
    %c0_34 = arith.constant 0 : index
    %31 = vector.load %arg5[%c1_32, %c0_33, %c0_34] : memref<3x1x128xf32, #tpu.memory_space<vmem>>, vector<1x1x128xf32>
    %32 = vector.shape_cast %31 : vector<1x1x128xf32> to vector<1x128xf32>
    %cst_35 = arith.constant 0.000000e+00 : f32
    %33 = vector.broadcast %cst_35 : f32 to vector<16x128xf32>
    %c0_36 = arith.constant 0 : index
    %c0_37 = arith.constant 0 : index
    %34 = vector.load %arg7[%c0_36, %c0_37] : memref<18x128xf32, #tpu.memory_space<vmem>>, vector<16x128xf32>
    %c0_38 = arith.constant 0 : index
    %c0_39 = arith.constant 0 : index
    %c0_40 = arith.constant 0 : index
    %35 = vector.load %arg3[%c0_38, %c0_39, %c0_40] : memref<3x128x128xf32, #tpu.memory_space<vmem>>, vector<1x128x128xf32>
    %36 = vector.shape_cast %35 : vector<1x128x128xf32> to vector<128x128xf32>
    %cst_41 = arith.constant dense<0.000000e+00> : vector<16x128xf32>
    %37 = tpu.matmul %34, %36, %cst_41 {dimension_numbers = #tpu.dot_dimension_numbers<[1], [0], [0], [1], [0, 0, 1, 1], [], []>} : vector<16x128xf32>, vector<128x128xf32>, vector<16x128xf32> -> vector<16x128xf32>
    %38 = arith.addf %33, %37 : vector<16x128xf32>
    %c1_42 = arith.constant 1 : index
    %c0_43 = arith.constant 0 : index
    %39 = vector.load %arg7[%c1_42, %c0_43] : memref<18x128xf32, #tpu.memory_space<vmem>>, vector<16x128xf32>
    %c1_44 = arith.constant 1 : index
    %c0_45 = arith.constant 0 : index
    %c0_46 = arith.constant 0 : index
    %40 = vector.load %arg3[%c1_44, %c0_45, %c0_46] : memref<3x128x128xf32, #tpu.memory_space<vmem>>, vector<1x128x128xf32>
    %41 = vector.shape_cast %40 : vector<1x128x128xf32> to vector<128x128xf32>
    %cst_47 = arith.constant dense<0.000000e+00> : vector<16x128xf32>
    %42 = tpu.matmul %39, %41, %cst_47 {dimension_numbers = #tpu.dot_dimension_numbers<[1], [0], [0], [1], [0, 0, 1, 1], [], []>} : vector<16x128xf32>, vector<128x128xf32>, vector<16x128xf32> -> vector<16x128xf32>
    %43 = arith.addf %38, %42 : vector<16x128xf32>
    %c2_48 = arith.constant 2 : index
    %c0_49 = arith.constant 0 : index
    %44 = vector.load %arg7[%c2_48, %c0_49] : memref<18x128xf32, #tpu.memory_space<vmem>>, vector<16x128xf32>
    %c2_50 = arith.constant 2 : index
    %c0_51 = arith.constant 0 : index
    %c0_52 = arith.constant 0 : index
    %45 = vector.load %arg3[%c2_50, %c0_51, %c0_52] : memref<3x128x128xf32, #tpu.memory_space<vmem>>, vector<1x128x128xf32>
    %46 = vector.shape_cast %45 : vector<1x128x128xf32> to vector<128x128xf32>
    %cst_53 = arith.constant dense<0.000000e+00> : vector<16x128xf32>
    %47 = tpu.matmul %44, %46, %cst_53 {dimension_numbers = #tpu.dot_dimension_numbers<[1], [0], [0], [1], [0, 0, 1, 1], [], []>} : vector<16x128xf32>, vector<128x128xf32>, vector<16x128xf32> -> vector<16x128xf32>
    %48 = arith.addf %43, %47 : vector<16x128xf32>
    %49 = vector.broadcast %32 : vector<1x128xf32> to vector<16x128xf32>
    %50 = arith.addf %48, %49 : vector<16x128xf32>
    %cst_54 = arith.constant 0.000000e+00 : f32
    %51 = vector.broadcast %cst_54 : f32 to vector<16x128xf32>
    %52 = arith.maximumf %50, %51 : vector<16x128xf32>
    %c1_55 = arith.constant 1 : index
    %c0_56 = arith.constant 0 : index
    %53 = vector.load %arg8[%c1_55, %c0_56] : memref<18x128xf32, #tpu.memory_space<vmem>>, vector<16x128xf32>
    tpu.vector_store %arg8[%c1_55, %c0_56], %52 {strides = array<i32>} : memref<18x128xf32, #tpu.memory_space<vmem>>, vector<16x128xf32>,
    %c2_57 = arith.constant 2 : index
    %c0_58 = arith.constant 0 : index
    %c0_59 = arith.constant 0 : index
    %54 = vector.load %arg5[%c2_57, %c0_58, %c0_59] : memref<3x1x128xf32, #tpu.memory_space<vmem>>, vector<1x1x128xf32>
    %55 = vector.shape_cast %54 : vector<1x1x128xf32> to vector<1x128xf32>
    %cst_60 = arith.constant 0.000000e+00 : f32
    %56 = vector.broadcast %cst_60 : f32 to vector<16x128xf32>
    %c0_61 = arith.constant 0 : index
    %c0_62 = arith.constant 0 : index
    %57 = vector.load %arg8[%c0_61, %c0_62] : memref<18x128xf32, #tpu.memory_space<vmem>>, vector<16x128xf32>
    %c0_63 = arith.constant 0 : index
    %c0_64 = arith.constant 0 : index
    %c0_65 = arith.constant 0 : index
    %58 = vector.load %arg4[%c0_63, %c0_64, %c0_65] : memref<3x128x128xf32, #tpu.memory_space<vmem>>, vector<1x128x128xf32>
    %59 = vector.shape_cast %58 : vector<1x128x128xf32> to vector<128x128xf32>
    %cst_66 = arith.constant dense<0.000000e+00> : vector<16x128xf32>
    %60 = tpu.matmul %57, %59, %cst_66 {dimension_numbers = #tpu.dot_dimension_numbers<[1], [0], [0], [1], [0, 0, 1, 1], [], []>} : vector<16x128xf32>, vector<128x128xf32>, vector<16x128xf32> -> vector<16x128xf32>
    %61 = arith.addf %56, %60 : vector<16x128xf32>
    %c1_67 = arith.constant 1 : index
    %c0_68 = arith.constant 0 : index
    %62 = vector.load %arg8[%c1_67, %c0_68] : memref<18x128xf32, #tpu.memory_space<vmem>>, vector<16x128xf32>
    %c1_69 = arith.constant 1 : index
    %c0_70 = arith.constant 0 : index
    %c0_71 = arith.constant 0 : index
    %63 = vector.load %arg4[%c1_69, %c0_70, %c0_71] : memref<3x128x128xf32, #tpu.memory_space<vmem>>, vector<1x128x128xf32>
    %64 = vector.shape_cast %63 : vector<1x128x128xf32> to vector<128x128xf32>
    %cst_72 = arith.constant dense<0.000000e+00> : vector<16x128xf32>
    %65 = tpu.matmul %62, %64, %cst_72 {dimension_numbers = #tpu.dot_dimension_numbers<[1], [0], [0], [1], [0, 0, 1, 1], [], []>} : vector<16x128xf32>, vector<128x128xf32>, vector<16x128xf32> -> vector<16x128xf32>
    %66 = arith.addf %61, %65 : vector<16x128xf32>
    %c2_73 = arith.constant 2 : index
    %c0_74 = arith.constant 0 : index
    %67 = vector.load %arg8[%c2_73, %c0_74] : memref<18x128xf32, #tpu.memory_space<vmem>>, vector<16x128xf32>
    %c2_75 = arith.constant 2 : index
    %c0_76 = arith.constant 0 : index
    %c0_77 = arith.constant 0 : index
    %68 = vector.load %arg4[%c2_75, %c0_76, %c0_77] : memref<3x128x128xf32, #tpu.memory_space<vmem>>, vector<1x128x128xf32>
    %69 = vector.shape_cast %68 : vector<1x128x128xf32> to vector<128x128xf32>
    %cst_78 = arith.constant dense<0.000000e+00> : vector<16x128xf32>
    %70 = tpu.matmul %67, %69, %cst_78 {dimension_numbers = #tpu.dot_dimension_numbers<[1], [0], [0], [1], [0, 0, 1, 1], [], []>} : vector<16x128xf32>, vector<128x128xf32>, vector<16x128xf32> -> vector<16x128xf32>
    %71 = arith.addf %66, %70 : vector<16x128xf32>
    %72 = vector.broadcast %55 : vector<1x128xf32> to vector<16x128xf32>
    %73 = arith.addf %71, %72 : vector<16x128xf32>
    %74 = arith.addf %29, %73 : vector<16x128xf32>
    %cst_79 = arith.constant 0.000000e+00 : f32
    %75 = vector.broadcast %cst_79 : f32 to vector<16x128xf32>
    %76 = arith.maximumf %74, %75 : vector<16x128xf32>
    %c0_80 = arith.constant 0 : index
    %c0_81 = arith.constant 0 : index
    %c0_82 = arith.constant 0 : index
    %77 = vector.load %arg6[%c0_80, %c0_81, %c0_82] : memref<1x16x128xf32, #tpu.memory_space<vmem>>, vector<1x16x128xf32>
    %78 = vector.shape_cast %77 : vector<1x16x128xf32> to vector<16x128xf32>
    %79 = vector.shape_cast %76 : vector<16x128xf32> to vector<1x16x128xf32>
    tpu.vector_store %arg6[%c0_80, %c0_81, %c0_82], %79 {strides = array<i32>} : memref<1x16x128xf32, #tpu.memory_space<vmem>>, vector<1x16x128xf32>,
    return
  }
  func.func @transform_0(%arg0: i32) -> (i32, i32, i32) {
    %c0_i32 = arith.constant 0 : i32
    %c0_i32_0 = arith.constant 0 : i32
    %c0_i32_1 = arith.constant 0 : i32
    return %arg0, %c0_i32, %c0_i32_0 : i32, i32, i32
  }
  func.func @transform_1(%arg0: i32) -> (i32, i32, i32) {
    %c0_i32 = arith.constant 0 : i32
    %c0_i32_0 = arith.constant 0 : i32
    %c0_i32_1 = arith.constant 0 : i32
    %c0_i32_2 = arith.constant 0 : i32
    return %c0_i32, %c0_i32_0, %c0_i32_1 : i32, i32, i32
  }
  func.func @transform_2(%arg0: i32) -> (i32, i32, i32) {
    %c0_i32 = arith.constant 0 : i32
    %c0_i32_0 = arith.constant 0 : i32
    %c0_i32_1 = arith.constant 0 : i32
    %c0_i32_2 = arith.constant 0 : i32
    return %c0_i32, %c0_i32_0, %c0_i32_1 : i32, i32, i32
  }
  func.func @transform_3(%arg0: i32) -> (i32, i32, i32) {
    %c0_i32 = arith.constant 0 : i32
    %c0_i32_0 = arith.constant 0 : i32
    %c0_i32_1 = arith.constant 0 : i32
    %c0_i32_2 = arith.constant 0 : i32
    return %c0_i32, %c0_i32_0, %c0_i32_1 : i32, i32, i32
  }
  func.func @transform_4(%arg0: i32) -> (i32, i32, i32) {
    %c0_i32 = arith.constant 0 : i32
    %c0_i32_0 = arith.constant 0 : i32
    %c0_i32_1 = arith.constant 0 : i32
    %c0_i32_2 = arith.constant 0 : i32
    return %c0_i32, %c0_i32_0, %c0_i32_1 : i32, i32, i32
  }
  func.func @transform_5(%arg0: i32) -> (i32, i32, i32) {
    %c0_i32 = arith.constant 0 : i32
    %c0_i32_0 = arith.constant 0 : i32
    %c0_i32_1 = arith.constant 0 : i32
    return %arg0, %c0_i32, %c0_i32_0 : i32, i32, i32
  }
}

</mosaic_0001>

<bundles_post_ra>
// kernel: tile.18
= control target key start
LH: loop header
LB: loop body
LE: loop exit
PB: predicated region body
PF: predicated region fallthrough
CT: control target
= control target key end

     0   :  { %s28_s0 = inlined_call_operand.vmem [shape: f32[8], index: 0, kind: input, shape index: {}]   ;;  %s29_s1 = inlined_call_operand.vmem [shape: f32[16,8], index: 1, kind: output, shape index: {}]  }
   0x1   :  { %v4_v0 = vld [vmem:[%s28_s0] ss:$0 sm:$0xff] }
   0x2   :  { %5 = vst [vmem:[%s29_s1] sm:$0xff] %v4_v0  ;;  %8 = vst [vmem:[%s29_s1 + $0x8] sm:$0xff] %v4_v0 }

// kernel: tile.27
= control target key start
LH: loop header
LB: loop body
LE: loop exit
PB: predicated region body
PF: predicated region fallthrough
CT: control target
= control target key end

     0   :  { %s133_s10 = smov 120   ;;  %s134_s11 = smov 104   ;;  %vm3_vm0 = vcmask 64512   ;;  %vm9_vm1 = vcmask 1048512   ;;  %vm15_vm2 = vcmask 982912   ;;  %vm21_vm3 = vcmask 917312   ;;  %s209_s0 = inlined_call_operand.vmem [shape: f32[16,8], index: 0, kind: input, shape index: {}]   ;;  %s210_s1 = inlined_call_operand.vmem [shape: f32[1,128], index: 1, kind: output, shape index: {}]  }
   0x1   :  { %v103_v0 = vld [vmem:[%s209_s0 + $0xf] sm:$0x1]   ;;  %v105_v1 = vld [vmem:[%s209_s0 + $0xd] sm:$0x1]   ;;  %v104_v2 = vld [vmem:[%s209_s0 + $0xe] sm:$0x1]  }
   0x2   :  { %7 = vrot.lane.b32.xlu0 %v103_v0, %s133_s10  ;;  %19 = vrot.lane.b32.xlu1 %v105_v1, %s134_s11  ;;  %v106_v3 = vld [vmem:[%s209_s0 + $0xc] sm:$0x1]   ;;  %s135_s16 = smov 112   ;;  %s136_s17 = smov 96   ;;  %v107_v4 = vld [vmem:[%s209_s0 + $0xb] sm:$0x1]  }
   0x3   :  { %v108_v5 = vld [vmem:[%s209_s0 + $0xa] sm:$0x1]   ;;  %v2_v6 = vld [vmem:[%s209_s0] sm:$0x1]   ;;  %s137_s24 = smov 88   ;;  %s138_s25 = smov 80  }
   0x4   :  { %4 = vst.msk [vmem:[#allocation0] sm:$0x1] %vm3_vm0, %v2_v6   ;;  %v109_v7 = vld [vmem:[%s209_s0 + $0x9] sm:$0x1]   ;;  %v110_v8 = vld [vmem:[%s209_s0 + $0x8] sm:$0x1]  }
   0x5   :  { %s139_s30 = smov 72   ;;  %s140_s2 = smov 64   ;;  %v111_v9 = vld [vmem:[%s209_s0 + $0x7] sm:$0x1]   ;;  %v112_v10 = vld [vmem:[%s209_s0 + $0x6] sm:$0x1]  }
   0x6   :  { %13 = vrot.lane.b32.xlu0 %v104_v2, %s135_s16  ;;  %25 = vrot.lane.b32.xlu1 %v106_v3, %s136_s17  ;;  %s141_s7 = smov 56   ;;  %s142_s8 = smov 48   ;;  %v113_v11 = vld [vmem:[%s209_s0 + $0x5] sm:$0x1]   ;;  %v114_v12 = vld [vmem:[%s209_s0 + $0x4] sm:$0x1]  }
   0x7   :  { %s143_s13 = smov 40   ;;  %s144_s14 = smov 32   ;;  %v115_v13 = vld [vmem:[%s209_s0 + $0x3] sm:$0x1]   ;;  %v116_v14 = vld [vmem:[%s209_s0 + $0x2] sm:$0x1]  }
   0x8   :  { %s145_s19 = smov 24   ;;  %s146_s20 = smov 16   ;;  %v117_v15 = vld [vmem:[%s209_s0 + $0x1] sm:$0x1]   ;;  %vm27_vm4 = vcmask 851712   ;;  %vm33_vm5 = vcmask 786112  }
   0x9   :  { %s147_s0 = smov 8   ;;  %vm39_vm6 = vcmask 720512   ;;  %vm45_vm7 = vcmask 654912   ;;  %vm51_vm8 = vcmask 589312   ;;  %vm57_vm9 = vcmask 523712  }
   0xa   :  { %31 = vrot.lane.b32.xlu0 %v107_v4, %s137_s24  ;;  %37 = vrot.lane.b32.xlu1 %v108_v5, %s138_s25  ;;  %vm63_vm10 = vcmask 458112   ;;  %vm69_vm11 = vcmask 392512   ;;  %vm75_vm12 = vcmask 326912   ;;  %vm81_vm13 = vcmask 261312  }
   0xb   :  { %vm87_vm14 = vcmask 195712   ;;  %vm93_vm15 = vcmask 130112  }
   0xe   :  { %43 = vrot.lane.b32.xlu0 %v109_v7, %s139_s30  ;;  %49 = vrot.lane.b32.xlu1 %v110_v8, %s140_s2 }
  0x12   :  { %55 = vrot.lane.b32.xlu0 %v111_v9, %s141_s7  ;;  %61 = vrot.lane.b32.xlu1 %v112_v10, %s142_s8 }
  0x16   :  { %67 = vrot.lane.b32.xlu0 %v113_v11, %s143_s13  ;;  %73 = vrot.lane.b32.xlu1 %v114_v12, %s144_s14 }
  0x1a   :  { %79 = vrot.lane.b32.xlu0 %v115_v13, %s145_s19  ;;  %85 = vrot.lane.b32.xlu1 %v116_v14, %s146_s20 }
  0x1e   :  { %91 = vrot.lane.b32.xlu0 %v117_v15, %s147_s0 }
  0x74   :  { %v8_v16 = vpop.permute.xlu0 %7   ;;  %v20_v17 = vpop.permute.xlu1 %19  }
  0x75   :  { %10 = vst.msk [vmem:[#allocation0] sm:$0x1] %vm9_vm1, %v8_v16  }
  0x78   :  { %v14_v18 = vpop.permute.xlu0 %13   ;;  %v26_v19 = vpop.permute.xlu1 %25  }
  0x79   :  { %16 = vst.msk [vmem:[#allocation0] sm:$0x1] %vm15_vm2, %v14_v18  }
  0x7a   :  { %22 = vst.msk [vmem:[#allocation0] sm:$0x1] %vm21_vm3, %v20_v17  }
  0x7b   :  { %28 = vst.msk [vmem:[#allocation0] sm:$0x1] %vm27_vm4, %v26_v19  }
  0x7c   :  { %v32_v20 = vpop.permute.xlu0 %31   ;;  %v38_v21 = vpop.permute.xlu1 %37  }
  0x7d   :  { %34 = vst.msk [vmem:[#allocation0] sm:$0x1] %vm33_vm5, %v32_v20  }
  0x7e   :  { %40 = vst.msk [vmem:[#allocation0] sm:$0x1] %vm39_vm6, %v38_v21  }
  0x80   :  { %v44_v22 = vpop.permute.xlu0 %43   ;;  %v50_v23 = vpop.permute.xlu1 %49  }
  0x81   :  { %46 = vst.msk [vmem:[#allocation0] sm:$0x1] %vm45_vm7, %v44_v22  }
  0x82   :  { %52 = vst.msk [vmem:[#allocation0] sm:$0x1] %vm51_vm8, %v50_v23  }
  0x84   :  { %v56_v24 = vpop.permute.xlu0 %55   ;;  %v62_v25 = vpop.permute.xlu1 %61  }
  0x85   :  { %58 = vst.msk [vmem:[#allocation0] sm:$0x1] %vm57_vm9, %v56_v24  }
  0x86   :  { %64 = vst.msk [vmem:[#allocation0] sm:$0x1] %vm63_vm10, %v62_v25  }
  0x88   :  { %v68_v26 = vpop.permute.xlu0 %67   ;;  %v74_v27 = vpop.permute.xlu1 %73  }
  0x89   :  { %70 = vst.msk [vmem:[#allocation0] sm:$0x1] %vm69_vm11, %v68_v26  }
  0x8a   :  { %76 = vst.msk [vmem:[#allocation0] sm:$0x1] %vm75_vm12, %v74_v27  }
  0x8c   :  { %v80_v28 = vpop.permute.xlu0 %79   ;;  %v86_v29 = vpop.permute.xlu1 %85  }
  0x8d   :  { %82 = vst.msk [vmem:[#allocation0] sm:$0x1] %vm81_vm13, %v80_v28  }
  0x8e   :  { %88 = vst.msk [vmem:[#allocation0] sm:$0x1] %vm87_vm14, %v86_v29  }
  0x90   :  { %v92_v30 = vpop.permute.xlu0 %91  }
  0x91   :  { %94 = vst.msk [vmem:[#allocation0] sm:$0x1] %vm93_vm15, %v92_v30  }
  0x98   :  { %v99_v31 = vld [vmem:[#allocation0] sm:$0x1] }
  0x99   :  { %102 = vst [vmem:[%s210_s1] sm:$0x1] %v99_v31 }

// kernel: resblock_forward.1
= control target key start
LH: loop header
LB: loop body
LE: loop exit
PB: predicated region body
PF: predicated region fallthrough
CT: control target
= control target key end

     0   :  { %s1727_s18 = smov 0   ;;  %s2141_s0 = inlined_call_operand.vmem [shape: f32[2,18,64], index: 0, kind: input, shape index: {}]   ;;  %s2142_s1 = inlined_call_operand.vmem [shape: f32[3,64,128], index: 1, kind: input, shape index: {}]   ;;  %s2143_s2 = inlined_call_operand.vmem [shape: f32[3,128,128], index: 2, kind: input, shape index: {}]   ;;  %s2144_s3 = inlined_call_operand.vmem [shape: f32[3,128,128], index: 3, kind: input, shape index: {}]   ;;  %s2145_s4 = inlined_call_operand.vmem [shape: f32[3,1,128], index: 4, kind: input, shape index: {}]   ;;  %s2146_s5 = inlined_call_operand.vmem [shape: f32[2,16,128], index: 5, kind: output, shape index: {}]  }
   0x1 LB: > { %s1171_s19 = sadd.s32 4294967295, %s1694_s18   ;;  %p1175_p0 = scmp.ge.s32.totalorder %s1694_s18, 1  ;;  %s1694_s18 = sphi %s1727_s18, %s15_s18  }
   0x2   : > { %p187_p1 = scmp.lt.s32.totalorder %s1694_s18, 3 }
   0x4   : > { %p188_p2 = pnand %p1175_p0, %p187_p1 }
   0x5   : > { %p215_p3 = scmp.lt.s32.totalorder (!%p188_p2), %s1171_s19, 1 }
   0x6   : > { %191 = sbr.rel (%p188_p2) target bundleno = 720 (0x2d0), region = 40 }
   0xb   : > { %v1186_v0 = vld [vmem:[%s2142_s1 + $0x78] sm:$0xff]  ;;  %v1185_v2 = vld [vmem:[%s2142_s1 + $0x70] sm:$0xff]  ;;  %v1184_v4 = vld [vmem:[%s2142_s1 + $0x68] sm:$0xff]  ;;  %s2148_s19 = smov (!%p215_p3, %s1171_s19), 1  ;;  %vm251_vm0 = vcmask 523264   ;;  %v1696_v58 = vmov 0.0  }
   0xc   : > { %v239_v1 = vld [vmem:[%s2142_s1 + $0x38] sm:$0xff]  ;;  %1411 = vmatprep.subr.mxu0 %v1186_v0  ;;  %v238_v3 = vld [vmem:[%s2142_s1 + $0x30] sm:$0xff]  ;;  %v237_v5 = vld [vmem:[%s2142_s1 + $0x28] sm:$0xff]  ;;  %s1678_s15 = smul.u32 24, %s2148_s19  ;;  %225 = vst [vmem:[#allocation2] sm:$0x1] %v1696_v58 }
   0xd   : > { %1430 = vmatprep.subr.mxu1 %v239_v1  ;;  %1412 = vmatpush3.msra.mxu0 %v1186_v0  ;;  %v1183_v6 = vld [vmem:[%s2142_s1 + $0x60] sm:$0xff]  ;;  %v1182_v8 = vld [vmem:[%s2142_s1 + $0x58] sm:$0xff]  ;;  %v1181_v10 = vld [vmem:[%s2142_s1 + $0x50] sm:$0xff]  ;;  %226 = vst [vmem:[#allocation2 + $0x11] sm:$0x1] %v1696_v58 }
   0xe   : > { %1431 = vmatpush3.msra.mxu1 %v239_v1  ;;  %1413 = vmatprep.subr.mxu0 %v1185_v2  ;;  %v236_v7 = vld [vmem:[%s2142_s1 + $0x20] sm:$0xff]  ;;  %v235_v9 = vld [vmem:[%s2142_s1 + $0x18] sm:$0xff]  ;;  %v234_v11 = vld [vmem:[%s2142_s1 + $0x10] sm:$0xff]  ;;  %s1783_s28 = scalar_lea.vmem %s2141_s0, %s1678_s15  ;;  %227 = vst [vmem:[#allocation3] sm:$0x1] %v1696_v58  ;;  %s1272_s15 = sshll.u32 %s2148_s19, 4 }
   0xf   : > { %1432 = vmatprep.subr.mxu1 %v238_v3  ;;  %1414 = vmatpush3.msra.mxu0 %v1185_v2  ;;  %v1180_v12 = vld [vmem:[%s2142_s1 + $0x48] sm:$0xff]  ;;  %v1179_v14 = vld [vmem:[%s2142_s1 + $0x40] sm:$0xff]  ;;  %v1198_v20 = vld [vmem:[%s2142_s1 + $0xb8] sm:$0xff]  ;;  %228 = vst [vmem:[#allocation3 + $0x11] sm:$0x1] %v1696_v58  ;;  %s224_s20 = scalar_lea.vmem %s2146_s5, %s1272_s15 }
  0x10   : > { %1433 = vmatpush3.msra.mxu1 %v238_v3  ;;  %1415 = vmatprep.subr.mxu0 %v1184_v4  ;;  %v233_v13 = vld [vmem:[%s2142_s1 + $0x8] sm:$0xff]  ;;  %v232_v15 = vld [vmem:[%s2142_s1] sm:$0xff]  ;;  %v1197_v22 = vld [vmem:[%s2142_s1 + $0xb0] sm:$0xff] }
  0x11   : > { %1434 = vmatprep.subr.mxu1 %v237_v5  ;;  %1416 = vmatpush3.msra.mxu0 %v1184_v4  ;;  %v240_v16 = vld [vmem:[%s1783_s28 + $0x1] sm:$0xff]  ;;  %v241_v18 = vld [vmem:[%s1783_s28 + $0x9] sm:$0xff]  ;;  %v1194_v25 = vld [vmem:[%s2142_s1 + $0x98] sm:$0xff] }
  0x12   : > { %1435 = vmatpush3.msra.mxu1 %v237_v5  ;;  %1417 = vmatprep.subr.mxu0 %v1183_v6  ;;  %v230_v17 = vld [vmem:[%s1783_s28] sm:$0xff]  ;;  %v231_v19 = vld [vmem:[%s1783_s28 + $0x8] sm:$0xff]  ;;  %v1193_v26 = vld [vmem:[%s2142_s1 + $0x90] sm:$0xff] }
  0x13   : > { %1436 = vmatprep.subr.mxu1 %v236_v7  ;;  %1418 = vmatpush3.msra.mxu0 %v1183_v6  ;;  %v414_v21 = vld [vmem:[%s1783_s28 + $0x2] sm:$0xff]  ;;  %v415_v29 = vld [vmem:[%s1783_s28 + $0xa] sm:$0xff]  ;;  %v1218_v30 = vld [vmem:[%s2143_s2 + $0xf8] sm:$0xff] }
  0x14   : > { %1437 = vmatpush3.msra.mxu1 %v236_v7  ;;  %1419 = vmatprep.subr.mxu0 %v1182_v8  ;;  %v1196_v23 = vld [vmem:[%s2142_s1 + $0xa8] sm:$0xff]  ;;  %v1195_v24 = vld [vmem:[%s2142_s1 + $0xa0] sm:$0xff]  ;;  %v1217_v31 = vld [vmem:[%s2143_s2 + $0xf0] sm:$0xff] }
  0x15   : > { %1438 = vmatprep.subr.mxu1 %v235_v9  ;;  %1420 = vmatpush3.msra.mxu0 %v1182_v8  ;;  %v1192_v27 = vld [vmem:[%s2142_s1 + $0x88] sm:$0xff]  ;;  %v1191_v28 = vld [vmem:[%s2142_s1 + $0x80] sm:$0xff]  ;;  %v1214_v34 = vld [vmem:[%s2143_s2 + $0xd8] sm:$0xff] }
  0x16   : > { %1439 = vmatpush3.msra.mxu1 %v235_v9  ;;  %1421 = vmatprep.subr.mxu0 %v1181_v10  ;;  %v1216_v32 = vld [vmem:[%s2143_s2 + $0xe8] sm:$0xff]  ;;  %v1215_v33 = vld [vmem:[%s2143_s2 + $0xe0] sm:$0xff]  ;;  %v539_v35 = vld [vmem:[%s2143_s2 + $0x78] sm:$0xff] }
  0x17   : > { %1440 = vmatprep.subr.mxu1 %v234_v11  ;;  %1422 = vmatpush3.msra.mxu0 %v1181_v10  ;;  %v538_v36 = vld [vmem:[%s2143_s2 + $0x70] sm:$0xff]  ;;  %v537_v37 = vld [vmem:[%s2143_s2 + $0x68] sm:$0xff]  ;;  %v536_v40 = vld [vmem:[%s2143_s2 + $0x60] sm:$0xff] }
  0x18   : > { %1441 = vmatpush3.msra.mxu1 %v234_v11  ;;  %1423 = vmatprep.subr.mxu0 %v1180_v12  ;;  %v1213_v38 = vld [vmem:[%s2143_s2 + $0xd0] sm:$0xff]  ;;  %v1212_v39 = vld [vmem:[%s2143_s2 + $0xc8] sm:$0xff]  ;;  %v1211_v41 = vld [vmem:[%s2143_s2 + $0xc0] sm:$0xff] }
  0x19   : > { %1442 = vmatprep.subr.mxu1 %v233_v13  ;;  %1424 = vmatpush3.msra.mxu0 %v1180_v12  ;;  %v535_v42 = vld [vmem:[%s2143_s2 + $0x58] sm:$0xff]  ;;  %v534_v44 = vld [vmem:[%s2143_s2 + $0x50] sm:$0xff]  ;;  %v533_v46 = vld [vmem:[%s2143_s2 + $0x48] sm:$0xff] }
  0x1a   : > { %1443 = vmatpush3.msra.mxu1 %v233_v13  ;;  %1425 = vmatprep.subr.mxu0 %v1179_v14  ;;  %v1210_v43 = vld [vmem:[%s2143_s2 + $0xb8] sm:$0xff]  ;;  %v1209_v45 = vld [vmem:[%s2143_s2 + $0xb0] sm:$0xff]  ;;  %v1208_v47 = vld [vmem:[%s2143_s2 + $0xa8] sm:$0xff] }
  0x1b   : > { %1444 = vmatprep.subr.mxu1 %v232_v15  ;;  %1426 = vmatpush3.msra.mxu0 %v1179_v14  ;;  %v1207_v48 = vld [vmem:[%s2143_s2 + $0xa0] sm:$0xff]  ;;  %v1206_v50 = vld [vmem:[%s2143_s2 + $0x98] sm:$0xff]  ;;  %v1205_v52 = vld [vmem:[%s2143_s2 + $0x90] sm:$0xff] }
  0x1c   : > { %1427 = vmatprep.mubr.msk.f32.mxu0 %vm251_vm0, %v240_v16  ;;  %1445 = vmatpush3.msra.mxu1 %v232_v15  ;;  %v532_v49 = vld [vmem:[%s2143_s2 + $0x40] sm:$0xff]  ;;  %v531_v51 = vld [vmem:[%s2143_s2 + $0x38] sm:$0xff]  ;;  %v530_v53 = vld [vmem:[%s2143_s2 + $0x30] sm:$0xff] }
  0x1d   : > { %1446 = vmatprep.mubr.msk.f32.mxu1 %vm251_vm0, %v230_v17  ;;  %1428 = vmatmul.mubr.msk.f32.vlgmr.msra.gmra.mxu0 %vm251_vm0, %v241_v18  ;;  %v1204_v54 = vld [vmem:[%s2143_s2 + $0x88] sm:$0xff]  ;;  %v1203_v56 = vld [vmem:[%s2143_s2 + $0x80] sm:$0xff]  ;;  %v1234_v59 = vld [vmem:[%s2143_s2 + $0x178] sm:$0xff] }
  0x1e   : > { %1447 = vmatmul.mubr.msk.f32.vlgmr.msra.gmra.mxu1 %vm251_vm0, %v231_v19  ;;  %1449 = vmatprep.subr.mxu0 %v1198_v20  ;;  %v529_v55 = vld [vmem:[%s2143_s2 + $0x28] sm:$0xff]  ;;  %v528_v57 = vld [vmem:[%s2143_s2 + $0x20] sm:$0xff]  ;;  %v527_v60 = vld [vmem:[%s2143_s2 + $0x18] sm:$0xff] }
  0x1f   : > { %1465 = vmatprep.mubr.msk.f32.mxu0 %vm251_vm0, %v414_v21  ;;  %1450 = vmatpush3.msra.mxu0 %v1198_v20  ;;  %v526_v61 = vld [vmem:[%s2143_s2 + $0x10] sm:$0xff]  ;;  %v525_v62 = vld [vmem:[%s2143_s2 + $0x8] sm:$0xff]  ;;  %v524_v63 = vld [vmem:[%s2143_s2] sm:$0xff] }
  0x20   : > { %1451 = vmatprep.subr.mxu0 %v1197_v22  ;;  %1468 = vmatprep.subr.mxu1 %v1218_v30  ;;  %v1201_v5 = vld [vmem:[%s2145_s4] ss:$0 sm:$0xff]  ;;  %v1233_v15 = vld [vmem:[%s2143_s2 + $0x170] sm:$0xff]  ;;  %v1232_v16 = vld [vmem:[%s2143_s2 + $0x168] sm:$0xff] }
  0x21   : > { %1452 = vmatpush3.msra.mxu0 %v1197_v22  ;;  %1469 = vmatpush3.msra.mxu1 %v1218_v30  ;;  %v1231_v17 = vld [vmem:[%s2143_s2 + $0x160] sm:$0xff]  ;;  %v1230_v18 = vld [vmem:[%s2143_s2 + $0x158] sm:$0xff]  ;;  %v1229_v22 = vld [vmem:[%s2143_s2 + $0x150] sm:$0xff] }
  0x22   : > { %1453 = vmatprep.subr.mxu0 %v1196_v23  ;;  %1470 = vmatprep.subr.mxu1 %v1217_v31  ;;  %v1221_v30 = vld [vmem:[%s2143_s2 + $0x110] sm:$0xff]  ;;  %v1238_v58 = vld [vmem:[%s2144_s3 + $0x88] sm:$0xff] }
  0x23   : > { %1454 = vmatpush3.msra.mxu0 %v1196_v23  ;;  %1471 = vmatpush3.msra.mxu1 %v1217_v31  ;;  %v1228_v23 = vld [vmem:[%s2143_s2 + $0x148] sm:$0xff] }
  0x24   : > { %1455 = vmatprep.subr.mxu0 %v1195_v24  ;;  %1472 = vmatprep.subr.mxu1 %v1216_v32  ;;  %v1220_v31 = vld [vmem:[%s2143_s2 + $0x108] sm:$0xff] }
  0x25   : > { %1456 = vmatpush3.msra.mxu0 %v1195_v24  ;;  %1473 = vmatpush3.msra.mxu1 %v1216_v32  ;;  %v1227_v24 = vld [vmem:[%s2143_s2 + $0x140] sm:$0xff] }
  0x26   : > { %1457 = vmatprep.subr.mxu0 %v1194_v25  ;;  %1474 = vmatprep.subr.mxu1 %v1215_v33  ;;  %v1219_v32 = vld [vmem:[%s2143_s2 + $0x100] sm:$0xff] }
  0x27   : > { %1458 = vmatpush3.msra.mxu0 %v1194_v25  ;;  %1475 = vmatpush3.msra.mxu1 %v1215_v33  ;;  %v1226_v25 = vld [vmem:[%s2143_s2 + $0x138] sm:$0xff] }
  0x28   : > { %1459 = vmatprep.subr.mxu0 %v1193_v26  ;;  %1476 = vmatprep.subr.mxu1 %v1214_v34 }
  0x29   : > { %1460 = vmatpush3.msra.mxu0 %v1193_v26  ;;  %1477 = vmatpush3.msra.mxu1 %v1214_v34  ;;  %v1225_v26 = vld [vmem:[%s2143_s2 + $0x130] sm:$0xff]  ;;  %v1252_v34 = vld [vmem:[%s2144_s3 + $0xf8] sm:$0xff] }
  0x2a   : > { %1461 = vmatprep.subr.mxu0 %v1192_v27  ;;  %1478 = vmatprep.subr.mxu1 %v1213_v38 }
  0x2b   : > { %1462 = vmatpush3.msra.mxu0 %v1192_v27  ;;  %1479 = vmatpush3.msra.mxu1 %v1213_v38  ;;  %v1224_v27 = vld [vmem:[%s2143_s2 + $0x128] sm:$0xff] }
  0x2c   : > { %1463 = vmatprep.subr.mxu0 %v1191_v28  ;;  %1480 = vmatprep.subr.mxu1 %v1212_v39  ;;  %v1250_v38 = vld [vmem:[%s2144_s3 + $0xe8] sm:$0xff] }
  0x2d   : > { %1464 = vmatpush3.msra.mxu0 %v1191_v28  ;;  %1481 = vmatpush3.msra.mxu1 %v1212_v39  ;;  %v1223_v28 = vld [vmem:[%s2143_s2 + $0x120] sm:$0xff]  ;;  %v834_v39 = vld [vmem:[%s2144_s3 + $0x68] sm:$0xff] }
  0x2e   : > { %1466 = vmatmul.mubr.msk.f32.vlgmr.msra.gmra.mxu0 %vm251_vm0, %v415_v29  ;;  %1503 = vmatprep.subr.mxu0 %v539_v35  ;;  %v1222_v29 = vld [vmem:[%s2143_s2 + $0x118] sm:$0xff] }
  0x2f   : > { %1504 = vmatpush3.msra.mxu0 %v539_v35  ;;  %1482 = vmatprep.subr.mxu1 %v1211_v41  ;;  %v836_v35 = vld [vmem:[%s2144_s3 + $0x78] sm:$0xff] }
  0x30   : > { %1505 = vmatprep.subr.mxu0 %v538_v36  ;;  %1483 = vmatpush3.msra.mxu1 %v1211_v41  ;;  %v833_v41 = vld [vmem:[%s2144_s3 + $0x60] sm:$0xff] }
  0x31   : > { %1506 = vmatpush3.msra.mxu0 %v538_v36  ;;  %1484 = vmatprep.subr.mxu1 %v1210_v43  ;;  %v1251_v36 = vld [vmem:[%s2144_s3 + $0xf0] sm:$0xff] }
  0x32   : > { %1507 = vmatprep.subr.mxu0 %v537_v37  ;;  %1485 = vmatpush3.msra.mxu1 %v1210_v43  ;;  %v832_v43 = vld [vmem:[%s2144_s3 + $0x58] sm:$0xff] }
  0x33   : > { %1508 = vmatpush3.msra.mxu0 %v537_v37  ;;  %1486 = vmatprep.subr.mxu1 %v1209_v45  ;;  %v835_v37 = vld [vmem:[%s2144_s3 + $0x70] sm:$0xff] }
  0x34   : > { %1509 = vmatprep.subr.mxu0 %v536_v40  ;;  %1487 = vmatpush3.msra.mxu1 %v1209_v45  ;;  %v831_v45 = vld [vmem:[%s2144_s3 + $0x50] sm:$0xff] }
  0x35   : > { %1510 = vmatpush3.msra.mxu0 %v536_v40  ;;  %1488 = vmatprep.subr.mxu1 %v1208_v47  ;;  %v1249_v40 = vld [vmem:[%s2144_s3 + $0xe0] sm:$0xff] }
  0x36   : > { %1511 = vmatprep.subr.mxu0 %v535_v42  ;;  %1489 = vmatpush3.msra.mxu1 %v1208_v47  ;;  %v830_v47 = vld [vmem:[%s2144_s3 + $0x48] sm:$0xff] }
  0x37   : > { %1512 = vmatpush3.msra.mxu0 %v535_v42  ;;  %1490 = vmatprep.subr.mxu1 %v1207_v48  ;;  %v1248_v42 = vld [vmem:[%s2144_s3 + $0xd8] sm:$0xff] }
  0x38   : > { %1513 = vmatprep.subr.mxu0 %v534_v44  ;;  %1491 = vmatpush3.msra.mxu1 %v1207_v48  ;;  %v1245_v48 = vld [vmem:[%s2144_s3 + $0xc0] sm:$0xff] }
  0x39   : > { %1514 = vmatpush3.msra.mxu0 %v534_v44  ;;  %1492 = vmatprep.subr.mxu1 %v1206_v50  ;;  %v1247_v44 = vld [vmem:[%s2144_s3 + $0xd0] sm:$0xff] }
  0x3a   : > { %1515 = vmatprep.subr.mxu0 %v533_v46  ;;  %1493 = vmatpush3.msra.mxu1 %v1206_v50  ;;  %v1243_v50 = vld [vmem:[%s2144_s3 + $0xb0] sm:$0xff] }
  0x3b   : > { %1516 = vmatpush3.msra.mxu0 %v533_v46  ;;  %1494 = vmatprep.subr.mxu1 %v1205_v52  ;;  %v1246_v46 = vld [vmem:[%s2144_s3 + $0xc8] sm:$0xff] }
  0x3c   : > { %1517 = vmatprep.subr.mxu0 %v532_v49  ;;  %1495 = vmatpush3.msra.mxu1 %v1205_v52  ;;  %v1241_v52 = vld [vmem:[%s2144_s3 + $0xa0] sm:$0xff] }
  0x3d   : > { %1518 = vmatpush3.msra.mxu0 %v532_v49  ;;  %1496 = vmatprep.subr.mxu1 %v1204_v54  ;;  %v1244_v49 = vld [vmem:[%s2144_s3 + $0xb8] sm:$0xff] }
  0x3e   : > { %1519 = vmatprep.subr.mxu0 %v531_v51  ;;  %1497 = vmatpush3.msra.mxu1 %v1204_v54  ;;  %v1240_v54 = vld [vmem:[%s2144_s3 + $0x98] sm:$0xff] }
  0x3f   : > { %1520 = vmatpush3.msra.mxu0 %v531_v51  ;;  %1498 = vmatprep.subr.mxu1 %v1203_v56  ;;  %v1242_v51 = vld [vmem:[%s2144_s3 + $0xa8] sm:$0xff] }
  0x40   : > { %1521 = vmatprep.subr.mxu0 %v530_v53  ;;  %1499 = vmatpush3.msra.mxu1 %v1203_v56  ;;  %v1239_v56 = vld [vmem:[%s2144_s3 + $0x90] sm:$0xff] }
  0x41   : > { %1522 = vmatpush3.msra.mxu0 %v530_v53  ;;  %1538 = vmatprep.subr.mxu1 %v1234_v59  ;;  %v829_v53 = vld [vmem:[%s2144_s3 + $0x40] sm:$0xff] }
  0x42   : > { %1523 = vmatprep.subr.mxu0 %v529_v55 }
  0x43   : > { %1524 = vmatpush3.msra.mxu0 %v529_v55  ;;  %v828_v55 = vld [vmem:[%s2144_s3 + $0x38] sm:$0xff] }
  0x44   : > { %1525 = vmatprep.subr.mxu0 %v528_v57 }
  0x45   : > { %1526 = vmatpush3.msra.mxu0 %v528_v57  ;;  %v827_v57 = vld [vmem:[%s2144_s3 + $0x30] sm:$0xff] }
  0x46   : > { %1527 = vmatprep.subr.mxu0 %v527_v60 }
  0x47   : > { %1528 = vmatpush3.msra.mxu0 %v527_v60  ;;  %v1237_v60 = vld [vmem:[%s2144_s3 + $0x80] sm:$0xff] }
  0x48   : > { %1529 = vmatprep.subr.mxu0 %v526_v61 }
  0x49   : > { %1530 = vmatpush3.msra.mxu0 %v526_v61  ;;  %v825_v61 = vld [vmem:[%s2144_s3 + $0x20] sm:$0xff] }
  0x4a   : > { %1531 = vmatprep.subr.mxu0 %v525_v62 }
  0x4b   : > { %1532 = vmatpush3.msra.mxu0 %v525_v62  ;;  %v1268_v62 = vld [vmem:[%s2144_s3 + $0x178] sm:$0xff] }
  0x4c   : > { %1533 = vmatprep.subr.mxu0 %v524_v63 }
  0x4d   : > { %1534 = vmatpush3.msra.mxu0 %v524_v63  ;;  %v824_v63 = vld [vmem:[%s2144_s3 + $0x18] sm:$0xff] }
  0x4e   : > { %1573 = vmatprep.subr.mxu0 %v1252_v34 }
  0xdd   : > { %v1429_v0 = vpop.f32.mrf.mxu0 }
  0xde   : > { %v1448_v1 = vpop.f32.mrf.mxu1 }
  0xdf   : > { %v324_v2 = vpop.f32.mrf.mxu0  ;;  %v411_v4 = vadd.f32 %v1448_v1, %v1429_v0  ;;  %v823_v0 = vld [vmem:[%s2144_s3 + $0x10] sm:$0xff]  ;;  %v822_v1 = vld [vmem:[%s2144_s3 + $0x8] sm:$0xff] }
  0xe0   : > { %v405_v3 = vpop.f32.mrf.mxu1 }
  0xe1   : > { %v406_v7 = vadd.f32 %v405_v3, %v324_v2  ;;  %v821_v2 = vld [vmem:[%s2144_s3] sm:$0xff] }
  0xee   : > { %v1467_v6 = vpop.f32.mrf.mxu0 }
  0xef   : > { %v507_v8 = vadd.f32 %v1467_v6, %v411_v4 }
  0xf0   : > { %v497_v9 = vpop.f32.mrf.mxu0 }
  0xf1   : > { %v515_v10 = vadd.f32 %v1201_v5, %v507_v8  ;;  %v506_v11 = vadd.f32 %v497_v9, %v406_v7  ;;  %v1235_v8 = vld [vmem:[%s2145_s4 + $0x1] ss:$0 sm:$0xff] }
  0xf3   : > { %v1929_v12 = vmax.f32 %v515_v10, 0.0  ;;  %v514_v13 = vadd.f32 %v1201_v5, %v506_v11 }
  0xf5   : > { %519 = vst [vmem:[#allocation2 + $0x9] sm:$0xff] %v1929_v12  ;;  %v1932_v14 = vmax.f32 %v514_v13, 0.0 }
  0xf7   : > { %518 = vst [vmem:[#allocation2 + $0x1] sm:$0xff] %v1932_v14  ;;  %1500 = vmatprep.mubr.f32.mxu1 %v1932_v14 }
  0xf8   : > { %1501 = vmatmul.mubr.f32.vlgmr.msra.gmra.mxu1 %v1929_v12 }
  0xf9   : > { %1539 = vmatpush3.msra.mxu1 %v1234_v59  ;;  %v826_v59 = vld [vmem:[%s2144_s3 + $0x28] sm:$0xff] }
  0xfa   : > { %1540 = vmatprep.subr.mxu1 %v1233_v15 }
  0xfb   : > { %1541 = vmatpush3.msra.mxu1 %v1233_v15 }
  0xfc   : > { %1542 = vmatprep.subr.mxu1 %v1232_v16  ;;  %v710_v33 = vld [vmem:[#allocation2 + $0xa] sm:$0xff] }
  0xfd   : > { %1543 = vmatpush3.msra.mxu1 %v1232_v16 }
  0xfe   : > { %v522_v19 = vld [vmem:[#allocation2] sm:$0xff]  ;;  %v523_v20 = vld [vmem:[#allocation2 + $0x8] sm:$0xff]  ;;  %1544 = vmatprep.subr.mxu1 %v1231_v17 }
  0xff   : > { %v709_v21 = vld [vmem:[#allocation2 + $0x2] sm:$0xff]  ;;  %1535 = vmatprep.mubr.f32.mxu0 %v522_v19  ;;  %1545 = vmatpush3.msra.mxu1 %v1231_v17 }
 0x100   : > { %1570 = vmatprep.mubr.f32.mxu1 %v709_v21  ;;  %1536 = vmatmul.mubr.f32.vlgmr.msra.gmra.mxu0 %v523_v20  ;;  %v1267_v20 = vld [vmem:[%s2144_s3 + $0x170] sm:$0xff]  ;;  %v1266_v21 = vld [vmem:[%s2144_s3 + $0x168] sm:$0xff] }
 0x101   : > { %1546 = vmatprep.subr.mxu1 %v1230_v18  ;;  %1574 = vmatpush3.msra.mxu0 %v1252_v34  ;;  %v1256_v34 = vld [vmem:[%s2144_s3 + $0x118] sm:$0xff] }
 0x102   : > { %1547 = vmatpush3.msra.mxu1 %v1230_v18  ;;  %1575 = vmatprep.subr.mxu0 %v1251_v36 }
 0x103   : > { %1548 = vmatprep.subr.mxu1 %v1229_v22  ;;  %1576 = vmatpush3.msra.mxu0 %v1251_v36  ;;  %v1254_v36 = vld [vmem:[%s2144_s3 + $0x108] sm:$0xff] }
 0x104   : > { %1549 = vmatpush3.msra.mxu1 %v1229_v22  ;;  %1577 = vmatprep.subr.mxu0 %v1250_v38  ;;  %v1265_v22 = vld [vmem:[%s2144_s3 + $0x160] sm:$0xff] }
 0x105   : > { %1550 = vmatprep.subr.mxu1 %v1228_v23  ;;  %1578 = vmatpush3.msra.mxu0 %v1250_v38 }
 0x106   : > { %1551 = vmatpush3.msra.mxu1 %v1228_v23  ;;  %1579 = vmatprep.subr.mxu0 %v1249_v40  ;;  %v1264_v23 = vld [vmem:[%s2144_s3 + $0x158] sm:$0xff] }
 0x107   : > { %1552 = vmatprep.subr.mxu1 %v1227_v24  ;;  %1580 = vmatpush3.msra.mxu0 %v1249_v40 }
 0x108   : > { %1553 = vmatpush3.msra.mxu1 %v1227_v24  ;;  %1581 = vmatprep.subr.mxu0 %v1248_v42 }
 0x109   : > { %1554 = vmatprep.subr.mxu1 %v1226_v25  ;;  %1582 = vmatpush3.msra.mxu0 %v1248_v42 }
 0x10a   : > { %1555 = vmatpush3.msra.mxu1 %v1226_v25  ;;  %1583 = vmatprep.subr.mxu0 %v1247_v44 }
 0x10b   : > { %1556 = vmatprep.subr.mxu1 %v1225_v26  ;;  %1584 = vmatpush3.msra.mxu0 %v1247_v44  ;;  %v1269_v44 = vld [vmem:[%s2145_s4 + $0x2] ss:$0 sm:$0xff] }
 0x10c   : > { %1557 = vmatpush3.msra.mxu1 %v1225_v26  ;;  %1585 = vmatprep.subr.mxu0 %v1246_v46 }
 0x10d   : > { %1558 = vmatprep.subr.mxu1 %v1224_v27  ;;  %1586 = vmatpush3.msra.mxu0 %v1246_v46 }
 0x10e   : > { %1559 = vmatpush3.msra.mxu1 %v1224_v27  ;;  %1587 = vmatprep.subr.mxu0 %v1245_v48  ;;  %v1263_v27 = vld [vmem:[%s2144_s3 + $0x150] sm:$0xff] }
 0x10f   : > { %1560 = vmatprep.subr.mxu1 %v1223_v28  ;;  %1588 = vmatpush3.msra.mxu0 %v1245_v48 }
 0x110   : > { %1561 = vmatpush3.msra.mxu1 %v1223_v28  ;;  %1589 = vmatprep.subr.mxu0 %v1244_v49  ;;  %v1262_v28 = vld [vmem:[%s2144_s3 + $0x148] sm:$0xff] }
 0x111   : > { %1562 = vmatprep.subr.mxu1 %v1222_v29  ;;  %1590 = vmatpush3.msra.mxu0 %v1244_v49 }
 0x112   : > { %1563 = vmatpush3.msra.mxu1 %v1222_v29  ;;  %1591 = vmatprep.subr.mxu0 %v1243_v50  ;;  %v1261_v29 = vld [vmem:[%s2144_s3 + $0x140] sm:$0xff] }
 0x113   : > { %1564 = vmatprep.subr.mxu1 %v1221_v30  ;;  %1592 = vmatpush3.msra.mxu0 %v1243_v50 }
 0x114   : > { %1565 = vmatpush3.msra.mxu1 %v1221_v30  ;;  %1593 = vmatprep.subr.mxu0 %v1242_v51  ;;  %v1260_v30 = vld [vmem:[%s2144_s3 + $0x138] sm:$0xff] }
 0x115   : > { %1566 = vmatprep.subr.mxu1 %v1220_v31  ;;  %1594 = vmatpush3.msra.mxu0 %v1242_v51 }
 0x116   : > { %1567 = vmatpush3.msra.mxu1 %v1220_v31  ;;  %1595 = vmatprep.subr.mxu0 %v1241_v52  ;;  %v1259_v31 = vld [vmem:[%s2144_s3 + $0x130] sm:$0xff] }
 0x117   : > { %1568 = vmatprep.subr.mxu1 %v1219_v32  ;;  %1596 = vmatpush3.msra.mxu0 %v1241_v52 }
 0x118   : > { %1569 = vmatpush3.msra.mxu1 %v1219_v32  ;;  %1597 = vmatprep.subr.mxu0 %v1240_v54  ;;  %v1258_v32 = vld [vmem:[%s2144_s3 + $0x128] sm:$0xff] }
 0x119   : > { %1571 = vmatmul.mubr.f32.vlgmr.msra.gmra.mxu1 %v710_v33  ;;  %1608 = vmatprep.subr.mxu1 %v836_v35  ;;  %v1257_v33 = vld [vmem:[%s2144_s3 + $0x120] sm:$0xff] }
 0x11a   : > { %1609 = vmatpush3.msra.mxu1 %v836_v35  ;;  %1598 = vmatpush3.msra.mxu0 %v1240_v54  ;;  %v1255_v35 = vld [vmem:[%s2144_s3 + $0x110] sm:$0xff] }
 0x11b   : > { %1610 = vmatprep.subr.mxu1 %v835_v37  ;;  %1599 = vmatprep.subr.mxu0 %v1239_v56 }
 0x11c   : > { %1611 = vmatpush3.msra.mxu1 %v835_v37  ;;  %1600 = vmatpush3.msra.mxu0 %v1239_v56  ;;  %v1253_v37 = vld [vmem:[%s2144_s3 + $0x100] sm:$0xff] }
 0x11d   : > { %1612 = vmatprep.subr.mxu1 %v834_v39  ;;  %1601 = vmatprep.subr.mxu0 %v1238_v58 }
 0x11e   : > { %1613 = vmatpush3.msra.mxu1 %v834_v39  ;;  %1602 = vmatpush3.msra.mxu0 %v1238_v58 }
 0x11f   : > { %1614 = vmatprep.subr.mxu1 %v833_v41  ;;  %1603 = vmatprep.subr.mxu0 %v1237_v60 }
 0x120   : > { %1615 = vmatpush3.msra.mxu1 %v833_v41  ;;  %1604 = vmatpush3.msra.mxu0 %v1237_v60 }
 0x121   : > { %1616 = vmatprep.subr.mxu1 %v832_v43  ;;  %1643 = vmatprep.subr.mxu0 %v1268_v62 }
 0x122   : > { %1617 = vmatpush3.msra.mxu1 %v832_v43 }
 0x123   : > { %1618 = vmatprep.subr.mxu1 %v831_v45 }
 0x124   : > { %1619 = vmatpush3.msra.mxu1 %v831_v45 }
 0x125   : > { %1620 = vmatprep.subr.mxu1 %v830_v47 }
 0x126   : > { %1621 = vmatpush3.msra.mxu1 %v830_v47 }
 0x127   : > { %1622 = vmatprep.subr.mxu1 %v829_v53 }
 0x128   : > { %1623 = vmatpush3.msra.mxu1 %v829_v53 }
 0x129   : > { %1624 = vmatprep.subr.mxu1 %v828_v55 }
 0x12a   : > { %1625 = vmatpush3.msra.mxu1 %v828_v55 }
 0x12b   : > { %1626 = vmatprep.subr.mxu1 %v827_v57 }
 0x12c   : > { %1627 = vmatpush3.msra.mxu1 %v827_v57 }
 0x12d   : > { %1628 = vmatprep.subr.mxu1 %v826_v59 }
 0x12e   : > { %1629 = vmatpush3.msra.mxu1 %v826_v59 }
 0x12f   : > { %1630 = vmatprep.subr.mxu1 %v825_v61 }
 0x130   : > { %1631 = vmatpush3.msra.mxu1 %v825_v61 }
 0x131   : > { %1632 = vmatprep.subr.mxu1 %v824_v63 }
 0x132   : > { %1633 = vmatpush3.msra.mxu1 %v824_v63 }
 0x133   : > { %1634 = vmatprep.subr.mxu1 %v823_v0 }
 0x134   : > { %1635 = vmatpush3.msra.mxu1 %v823_v0 }
 0x135   : > { %1636 = vmatprep.subr.mxu1 %v822_v1 }
 0x136   : > { %1637 = vmatpush3.msra.mxu1 %v822_v1 }
 0x137   : > { %1638 = vmatprep.subr.mxu1 %v821_v2 }
 0x138   : > { %1639 = vmatpush3.msra.mxu1 %v821_v2 }
 0x1b8   : > { %v1502_v3 = vpop.f32.mrf.mxu1 }
 0x1ba   : > { %v625_v5 = vpop.f32.mrf.mxu1 }
 0x1c0   : > { %v1537_v4 = vpop.f32.mrf.mxu0 }
 0x1c1   : > { %v706_v7 = vadd.f32 %v1537_v4, %v1502_v3 }
 0x1c2   : > { %v700_v6 = vpop.f32.mrf.mxu0 }
 0x1c3   : > { %v701_v10 = vadd.f32 %v700_v6, %v625_v5 }
 0x1d9   : > { %v1572_v9 = vpop.f32.mrf.mxu1 }
 0x1da   : > { %v804_v11 = vadd.f32 %v1572_v9, %v706_v7 }
 0x1db   : > { %v794_v13 = vpop.f32.mrf.mxu1 }
 0x1dc   : > { %v812_v15 = vadd.f32 %v1235_v8, %v804_v11  ;;  %v803_v16 = vadd.f32 %v794_v13, %v701_v10 }
 0x1de   : > { %v814_v17 = vmax.f32 %v812_v15, 0.0  ;;  %v811_v18 = vadd.f32 %v1235_v8, %v803_v16 }
 0x1e0   : > { %816 = vst [vmem:[#allocation3 + $0x9] sm:$0xff] %v814_v17  ;;  %v813_v19 = vmax.f32 %v811_v18, 0.0 }
 0x1e2   : > { %815 = vst [vmem:[#allocation3 + $0x1] sm:$0xff] %v813_v19  ;;  %1605 = vmatprep.mubr.f32.mxu0 %v813_v19 }
 0x1e3   : > { %1606 = vmatmul.mubr.f32.vlgmr.msra.gmra.mxu0 %v814_v17 }
 0x1e4   : > { %1644 = vmatpush3.msra.mxu0 %v1268_v62 }
 0x1e5   : > { %1645 = vmatprep.subr.mxu0 %v1267_v20 }
 0x1e6   : > { %1646 = vmatpush3.msra.mxu0 %v1267_v20 }
 0x1e7   : > { %1647 = vmatprep.subr.mxu0 %v1266_v21  ;;  %v1007_v38 = vld [vmem:[#allocation3 + $0xa] sm:$0xff] }
 0x1e8   : > { %1648 = vmatpush3.msra.mxu0 %v1266_v21 }
 0x1e9   : > { %v819_v24 = vld [vmem:[#allocation3] sm:$0xff]  ;;  %v820_v25 = vld [vmem:[#allocation3 + $0x8] sm:$0xff]  ;;  %1649 = vmatprep.subr.mxu0 %v1265_v22 }
 0x1ea   : > { %v1006_v26 = vld [vmem:[#allocation3 + $0x2] sm:$0xff]  ;;  %1640 = vmatprep.mubr.f32.mxu1 %v819_v24  ;;  %1650 = vmatpush3.msra.mxu0 %v1265_v22 }
 0x1eb   : > { %1675 = vmatprep.mubr.f32.mxu0 %v1006_v26  ;;  %1641 = vmatmul.mubr.f32.vlgmr.msra.gmra.mxu1 %v820_v25 }
 0x1ec   : > { %1651 = vmatprep.subr.mxu0 %v1264_v23 }
 0x1ed   : > { %1652 = vmatpush3.msra.mxu0 %v1264_v23 }
 0x1ee   : > { %1653 = vmatprep.subr.mxu0 %v1263_v27 }
 0x1ef   : > { %1654 = vmatpush3.msra.mxu0 %v1263_v27 }
 0x1f0   : > { %1655 = vmatprep.subr.mxu0 %v1262_v28 }
 0x1f1   : > { %1656 = vmatpush3.msra.mxu0 %v1262_v28 }
 0x1f2   : > { %1657 = vmatprep.subr.mxu0 %v1261_v29 }
 0x1f3   : > { %1658 = vmatpush3.msra.mxu0 %v1261_v29 }
 0x1f4   : > { %1659 = vmatprep.subr.mxu0 %v1260_v30 }
 0x1f5   : > { %1660 = vmatpush3.msra.mxu0 %v1260_v30 }
 0x1f6   : > { %1661 = vmatprep.subr.mxu0 %v1259_v31 }
 0x1f7   : > { %1662 = vmatpush3.msra.mxu0 %v1259_v31 }
 0x1f8   : > { %1663 = vmatprep.subr.mxu0 %v1258_v32 }
 0x1f9   : > { %1664 = vmatpush3.msra.mxu0 %v1258_v32 }
 0x1fa   : > { %1665 = vmatprep.subr.mxu0 %v1257_v33 }
 0x1fb   : > { %1666 = vmatpush3.msra.mxu0 %v1257_v33 }
 0x1fc   : > { %1667 = vmatprep.subr.mxu0 %v1256_v34 }
 0x1fd   : > { %1668 = vmatpush3.msra.mxu0 %v1256_v34 }
 0x1fe   : > { %1669 = vmatprep.subr.mxu0 %v1255_v35 }
 0x1ff   : > { %1670 = vmatpush3.msra.mxu0 %v1255_v35 }
 0x200   : > { %1671 = vmatprep.subr.mxu0 %v1254_v36 }
 0x201   : > { %1672 = vmatpush3.msra.mxu0 %v1254_v36 }
 0x202   : > { %1673 = vmatprep.subr.mxu0 %v1253_v37 }
 0x203   : > { %1674 = vmatpush3.msra.mxu0 %v1253_v37 }
 0x204   : > { %1676 = vmatmul.mubr.f32.vlgmr.msra.gmra.mxu0 %v1007_v38 }
 0x2a3   : > { %v1607_v39 = vpop.f32.mrf.mxu0 }
 0x2a5   : > { %v922_v41 = vpop.f32.mrf.mxu0 }
 0x2ab   : > { %v1642_v40 = vpop.f32.mrf.mxu1 }
 0x2ac   : > { %v1003_v43 = vadd.f32 %v1642_v40, %v1607_v39 }
 0x2ad   : > { %v997_v42 = vpop.f32.mrf.mxu1 }
 0x2ae   : > { %v998_v46 = vadd.f32 %v997_v42, %v922_v41 }
 0x2c4   : > { %v1677_v45 = vpop.f32.mrf.mxu0 }
 0x2c5   : > { %v1101_v47 = vadd.f32 %v1677_v45, %v1003_v43 }
 0x2c6   : > { %v1091_v48 = vpop.f32.mrf.mxu0 }
 0x2c7   : > { %v1109_v49 = vadd.f32 %v1269_v44, %v1101_v47  ;;  %v1100_v50 = vadd.f32 %v1091_v48, %v998_v46 }
 0x2c9   : > { %v1111_v51 = vadd.f32 %v1109_v49, %v1929_v12  ;;  %v1108_v52 = vadd.f32 %v1269_v44, %v1100_v50 }
 0x2cb   : > { %v1113_v53 = vmax.f32 %v1111_v51, 0.0  ;;  %v1110_v54 = vadd.f32 %v1108_v52, %v1932_v14 }
 0x2cd   : > { %1115 = vst [vmem:[%s224_s20 + $0x8] sm:$0xff] %v1113_v53  ;;  %v1112_v55 = vmax.f32 %v1110_v54, 0.0 }
 0x2cf   : > { %1114 = vst [vmem:[%s224_s20] sm:$0xff] %v1112_v55 }
 0x2d0 PF: > { %s15_s18 = sadd.s32 1, %s1694_s18  }
 0x2d1   : > { %p12_p4 = scmp.ge.s32.totalorder %s15_s18, 4  }
 0x2d3   :  { %14 = sbr.rel (!%p12_p4) target bundleno = 1 (0x1), region = 78 }

</bundles_post_ra>
